<compile_context>
chip_gen: v7x
topology: tpu7x:2x2x1
jax: 0.10.0
libtpu: 0.0.40
codegen_flags: <defaults>
</compile_context>

<pallas_src>
import math
import functools

import jax
import jax.numpy as jnp
from jax.experimental import pallas as pl
from jax.experimental.pallas import tpu as pltpu


# ----------------------------------------------------------------------------- helpers
def _round_up(x, m):
    return ((x + m - 1) // m) * m


def _tpu_vmem_limit_bytes():
    """Generation-aware scoped-VMEM request (~75% of physical per-core VMEM)."""
    cap = None
    try:
        info = pltpu.get_tpu_info()
        for name in ("vmem_capacity_bytes", "vmem_bytes", "vmem_size_bytes"):
            cap = getattr(info, name, None)
            if cap:
                break
    except Exception:
        cap = None
    if not cap:
        cap = 64 * 1024 * 1024        # v7x has the smallest per-TC VMEM (64 MiB)
    return int(cap) * 3 // 4          # ~48 MiB on v7x, ~96 MiB on v5e/v6e


def _weight_vmem_bytes(dim_in, n_score, c_pad, hidden, w_itemsize, buffers):
    """VMEM held by the grid-resident weight slabs (padded layouts)."""
    wall = _round_up(dim_in, 8) * (n_score + c_pad) * w_itemsize
    expd = _round_up(n_score, 8) * c_pad * 4
    w1b = _round_up(c_pad, 8) * _round_up(hidden, 128) * 4
    vecs = 2 * 8 * _round_up(hidden, 128) * 4          # b1 row + w2 row
    return buffers * (wall + expd + w1b + vecs)


def _tile_vmem_bytes(bt, n_obj, dim_in, n_score, c_pad, in_itemsize):
    """Per-grid-step VMEM: padded I/O blocks (double-buffered) + f32 intermediates."""
    rows = _round_up(bt * n_obj, 8)
    obj = 2 * rows * _round_up(dim_in, 128) * in_itemsize      # object tile (dbl-buffered)
    msk = 2 * _round_up(bt, 8) * _round_up(n_obj, 128) * 4     # mask tile (dbl-buffered)
    outb = 2 * 8 * _round_up(bt, 128) * 4                      # output tile (dbl-buffered)
    proj = rows * (n_score + c_pad) * 4                        # fused projection result
    soft = 3 * rows * n_score * 4                              # exp / attn temporaries
    attn = 2 * rows * c_pad * 4                                # expanded attn + weighted v
    m3 = rows * 128 * 4                                        # relayouted (bt, N, 1) mask
    dec = _round_up(bt, 8) * (c_pad + 2 * 128) * 4             # v_att + decoder temporaries
    return obj + msk + outb + proj + soft + attn + m3 + dec


def _pick_b_tile(batch, n_obj, dim_in, n_score, c_pad, in_itemsize, budget):
    """Largest batch tile that divides B, fits the (padded) VMEM budget, keeps legal
    block shapes, and leaves >= 2 (ideally >= 4) grid steps for large batches so both
    v7x TensorCores get work and the pipeline can overlap DMA with compute."""
    row_align = 16 if in_itemsize == 2 else 8       # bf16 packs 16 sublanes per vreg

    def legal(bt):
        if bt == batch:
            return True                             # full-array blocks are always legal
        return (bt * n_obj) % row_align == 0 and bt % 8 == 0

    def fits(bt):
        return _tile_vmem_bytes(bt, n_obj, dim_in, n_score, c_pad, in_itemsize) <= budget

    divs = sorted({d for i in range(1, int(batch ** 0.5) + 1) if batch % i == 0
                   for d in (i, batch // i)})
    steps = 4 if batch >= 512 else (2 if batch >= 64 else 1)
    cap = max(1, batch // steps)

    cands = [d for d in divs if d <= cap and legal(d) and fits(d)]
    if not cands:                                   # relax the multi-step preference
        cands = [d for d in divs if legal(d) and fits(d)]
    if not cands:                                   # nothing fits: smallest legal tile
        # TODO(synk): pad the batch in the wrapper for awkward batch factorizations.
        legal_divs = [d for d in divs if legal(d)] or [min(divs)]
        return min(legal_divs)
    lane_dense = [d for d in cands if d % 128 == 0 or d == batch]
    return max(lane_dense) if lane_dense else max(cands)


# ----------------------------------------------------------------------------- kernel
def reward_predictor_kernel(obj_ref, mask_ref, wall_ref, expand_ref,
                            w1_ref, b1_ref, w2_ref, b2_ref, out_ref,
                            *, n_obj, n_score, approx_recip):
    # obj_ref   : (bt*N, D)            objects for this batch tile (flattened in wrapper)
    # mask_ref  : (bt, N)              float mask, objects on the lane axis
    # wall_ref  : (D, n_score + Cp)    fused [per-head scores | head-major values]
    # expand_ref: (n_score, Cp)        0/1 head -> value-column expansion
    # w1_ref    : (Cp, H1), b1_ref: (1, H1), w2_ref: (1, H1), b2_ref: SMEM (1,)
    # out_ref   : (1, bt)              lane-dense output (batch on lanes)
    bt = mask_ref.shape[0]
    x = obj_ref[...]

    # One fused MXU matmul produces per-head scores and head-major values.
    y = jnp.dot(x, wall_ref[...], preferred_element_type=jnp.float32)    # (bt*N, ns+Cp)
    s = y[:, :n_score].reshape(bt, n_obj, n_score)                       # scores (per head)
    v = y[:, n_score:].reshape(bt, n_obj, -1)                            # values (head-major)

    # Masked softmax-like attention over objects, once per head.
    # NOTE: max is taken BEFORE the mask, and +1e-6 in the denominator -- matches PyTorch.
    m = mask_ref[...].astype(jnp.float32)[:, :, None]                    # (bt, N, 1) relayout
    a = jnp.exp(s - jnp.max(s, axis=1, keepdims=True))
    a = a * m
    denom = jnp.sum(a, axis=1, keepdims=True) + 1e-6
    if approx_recip:
        a = a * pl.reciprocal(denom, approx=True)
    else:
        a = a / denom

    # Expand per-head attention to the head-major value width via a tiny 0/1 matmul.
    a_wide = jnp.dot(a.reshape(bt * n_obj, n_score), expand_ref[...],
                     preferred_element_type=jnp.float32).reshape(bt, n_obj, -1)
    v_att = jnp.sum(v * a_wide, axis=1)                                  # (bt, Cp)

    # Decoder: Linear -> LeakyReLU(0.01) -> Linear(->1), last layer as a VPU lane reduce.
    h1 = jnp.dot(v_att, w1_ref[...], preferred_element_type=jnp.float32) + b1_ref[...]
    h1 = jnp.where(h1 > 0, h1, 0.01 * h1)
    out = jnp.sum(h1 * w2_ref[...], axis=-1) + b2_ref[0]                 # (bt,)
    out_ref[...] = out.reshape(1, -1).astype(out_ref.dtype)              # lane-dense store


# ----------------------------------------------------------------------------- wrapper
@functools.partial(jax.jit, static_argnames=("approx_recip", "single_buffer_weights"))
def _run_kernel(obj2d, mask2, w_all, expand, w1, b1, w2row, b2, *,
                approx_recip=False, single_buffer_weights=True):
    batch, n_obj = mask2.shape
    dim_in = obj2d.shape[1]
    n_score, c_pad = expand.shape
    hidden = w1.shape[1]
    in_item = jnp.dtype(obj2d.dtype).itemsize
    w_item = jnp.dtype(w_all.dtype).itemsize

    vmem_limit = _tpu_vmem_limit_bytes()
    weight_bufs = 1 if single_buffer_weights else 2
    weights_bytes = _weight_vmem_bytes(dim_in, n_score, c_pad, hidden, w_item, weight_bufs)
    budget = max(1 << 20, vmem_limit - weights_bytes - (2 << 20))
    b_tile = _pick_b_tile(batch, n_obj, dim_in, n_score, c_pad, in_item, budget)
    grid = (batch // b_tile,)

    def resident(shape):
        idx = lambda i: (0,) * len(shape)
        if single_buffer_weights and hasattr(pl, "Buffered"):
            return pl.BlockSpec(shape, idx, pipeline_mode=pl.Buffered(1))
        return pl.BlockSpec(shape, idx)

    kernel = functools.partial(reward_predictor_kernel, n_obj=n_obj,
                               n_score=n_score, approx_recip=approx_recip)
    out = pl.pallas_call(
        kernel,
        out_shape=jax.ShapeDtypeStruct((1, batch), jnp.float32),
        grid=grid,
        in_specs=[
            pl.BlockSpec((b_tile * n_obj, dim_in), lambda i: (i, 0)),    # objects, batch-tiled
            pl.BlockSpec((b_tile, n_obj), lambda i: (i, 0)),             # mask: N on lanes
            resident(w_all.shape),                                       # fused projections
            resident(expand.shape),                                      # 0/1 head expansion
            resident(w1.shape),
            resident(b1.shape),
            resident(w2row.shape),
            pl.BlockSpec(memory_space=pltpu.MemorySpace.SMEM),           # b2 scalar
        ],
        out_specs=pl.BlockSpec((1, b_tile), lambda i: (0, i)),           # lane-dense output
        compiler_params=pltpu.CompilerParams(
            dimension_semantics=("parallel",),
            vmem_limit_bytes=int(vmem_limit)),
    )(obj2d, mask2, w_all, expand, w1, b1, w2row, b2)
    return out


def pack_params(params, compute_dtype=jnp.float32):
    """Fold q / 1/sqrt(dk) into the K projection, fuse heads into one lane-aligned
    [scores | values] slab, and build the 0/1 head->value-column expansion matrix."""
    q, w_k, w_v = params["q"], params["w_k"], params["w_v"]
    n_head, dim_in, dim_k = w_k.shape
    dv_h = w_v.shape[2]
    c = n_head * dv_h
    n_score = _round_up(n_head, 128)          # lane-aligned score width (split boundary)
    c_pad = _round_up(c, 128)                 # lane-aligned value width

    # score column h = w_k[h] @ q[h] / sqrt(dim_k)
    w_score = jnp.einsum("hdk,hk->dh", w_k, q,
                         precision=jax.lax.Precision.HIGHEST) / math.sqrt(dim_k)
    # head-major value projection (D, C)
    w_val = jnp.transpose(w_v, (1, 0, 2)).reshape(dim_in, c)

    w_all = jnp.zeros((dim_in, n_score + c_pad), jnp.float32)
    w_all = w_all.at[:, :n_head].set(w_score)
    w_all = w_all.at[:, n_score:n_score + c].set(w_val)
    w_all = w_all.astype(compute_dtype)

    # expansion: per-head attention column h feeds value columns [h*dv_h, (h+1)*dv_h)
    col = jnp.arange(c_pad)
    col_head = jnp.where(col < c, col // dv_h, -1)
    expand = (jnp.arange(n_score)[:, None] == col_head[None, :]).astype(jnp.float32)

    hidden = params["w1"].shape[1]
    w1 = jnp.zeros((c_pad, hidden), jnp.float32).at[:c, :].set(
        params["w1"].astype(jnp.float32))
    b1 = params["b1"].astype(jnp.float32).reshape(1, -1)
    w2 = params["w2"].astype(jnp.float32).reshape(1, -1)      # (1, hidden) row vector
    b2 = params["b2"].astype(jnp.float32).reshape(-1)         # (1,) scalar for SMEM
    return w_all, expand, w1, b1, w2, b2


def reward_predictor_forward(params, encodings, obj_masks=None,
                             compute_dtype=jnp.float32, approx_recip=False):
    """encodings: dict clsname -> (B, n_obj_i, dim_in); obj_masks: dict clsname -> (B, n_obj_i) bool."""
    objects = jnp.concatenate(list(encodings.values()), axis=1)          # (B, N, D)
    batch, n_obj, dim_in = objects.shape
    if obj_masks is None:
        mask2 = jnp.ones((batch, n_obj), jnp.float32)
    else:
        mask2 = jnp.concatenate([obj_masks[k] for k in encodings.keys()],
                                axis=1).astype(jnp.float32)              # (B, N), N on lanes
    obj2d = objects.reshape(batch * n_obj, dim_in).astype(compute_dtype)
    fused = pack_params(params, compute_dtype)
    try:
        out = _run_kernel(obj2d, mask2, *fused, approx_recip=approx_recip,
                          single_buffer_weights=True)
    except Exception:
        # pl.Buffered(1) not supported by this jax build -> double-buffer the weights.
        out = _run_kernel(obj2d, mask2, *fused, approx_recip=approx_recip,
                          single_buffer_weights=False)
    return out[0]                                                        # (B,)


# ----------------------------------------------------------------------------- params / reference
def init_params(key, dim_in, dim_k, dim_v, n_head, dim_decoder_hidden):
    if dim_v % n_head != 0:
        dim_v = (dim_v // n_head + 1) * n_head
    dv_h = dim_v // n_head
    ks = jax.random.split(key, 7)
    bnd1 = 1.0 / math.sqrt(dim_v)
    bnd2 = 1.0 / math.sqrt(dim_decoder_hidden)
    params = {
        "q":   jax.random.normal(ks[0], (n_head, dim_k), jnp.float32),
        "w_k": jax.random.normal(ks[1], (n_head, dim_in, dim_k), jnp.float32),
        "w_v": jax.random.normal(ks[2], (n_head, dim_in, dv_h), jnp.float32),
        "w1":  jax.random.uniform(ks[3], (dim_v, dim_decoder_hidden), jnp.float32, -bnd1, bnd1),
        "b1":  jax.random.uniform(ks[4], (1, dim_decoder_hidden), jnp.float32, -bnd1, bnd1),
        "w2":  jax.random.uniform(ks[5], (dim_decoder_hidden, 1), jnp.float32, -bnd2, bnd2),
        "b2":  jax.random.uniform(ks[6], (1, 1), jnp.float32, -bnd2, bnd2),
    }
    return params, dim_v


def reference_forward(params, encodings, obj_masks=None):
    """Pure-JAX, per-head reference mirroring the PyTorch module (for correctness)."""
    objects = jnp.concatenate(list(encodings.values()), axis=1)
    batch, n_obj, _ = objects.shape
    dim_k = params["q"].shape[1]
    if obj_masks is None:
        mask = jnp.ones((batch, n_obj), jnp.float32)
    else:
        mask = jnp.concatenate([obj_masks[k] for k in encodings.keys()],
                               axis=1).astype(jnp.float32)
    k = jnp.einsum("bnd,hdk->bnhk", objects, params["w_k"])
    v = jnp.einsum("bnd,hdv->bnhv", objects, params["w_v"])
    a = jnp.sum(params["q"][None, None] * k, axis=-1) / math.sqrt(dim_k)   # (B, N, H)
    a = jnp.exp(a - jnp.max(a, axis=1, keepdims=True))
    a = a * mask[:, :, None]
    a = a / (jnp.sum(a, axis=1, keepdims=True) + 1e-6)
    v_ = jnp.sum(v * a[..., None], axis=1)                                 # (B, H, dv_h)
    x = v_.reshape(batch, -1)
    h1 = x @ params["w1"] + params["b1"]
    h1 = jnp.where(h1 > 0, h1, 0.01 * h1)
    return (h1 @ params["w2"] + params["b2"])[:, 0]


# ----------------------------------------------------------------------------- demo
if __name__ == "__main__":
    B = 2
    dim_in = 16
    dim_k = 16
    dim_v = 32
    n_head = 4
    dim_decoder_hidden = 32

    key = jax.random.PRNGKey(0)
    kp, k1, k2, km1, km2 = jax.random.split(key, 5)
    params, dim_v = init_params(kp, dim_in, dim_k, dim_v, n_head, dim_decoder_hidden)

    # Two "classes" of objects, concatenated along the object axis (N = 3 + 5 = 8).
    encodings = {
        "clsA": jax.random.normal(k1, (B, 3, dim_in), jnp.float32),
        "clsB": jax.random.normal(k2, (B, 5, dim_in), jnp.float32),
    }
    obj_masks = {
        "clsA": jax.random.bernoulli(km1, 0.8, (B, 3)),
        "clsB": jax.random.bernoulli(km2, 0.8, (B, 5)),
    }

    out = reward_predictor_forward(params, encodings, obj_masks)
    out = jax.block_until_ready(out)

    ref = reference_forward(params, encodings, obj_masks)
    assert out.shape == (B,)
    assert jnp.allclose(out, ref, atol=1e-4, rtol=1e-3), (out, ref)

    print("KERNEL_OK")
</pallas_src>

<mosaic_0001>
module attributes {stable_mosaic.version = 11 : i64} {
  func.func @reward_predictor_kernel(%arg0: i32, %arg1: memref<16x16xf32, #tpu.memory_space<vmem>>, %arg2: memref<2x8xf32, #tpu.memory_space<vmem>>, %arg3: memref<16x256xf32, #tpu.memory_space<vmem>>, %arg4: memref<128x128xf32, #tpu.memory_space<vmem>>, %arg5: memref<128x32xf32, #tpu.memory_space<vmem>>, %arg6: memref<1x32xf32, #tpu.memory_space<vmem>>, %arg7: memref<1x32xf32, #tpu.memory_space<vmem>>, %arg8: memref<1xf32, #tpu.memory_space<smem>>, %arg9: memref<1x2xf32, #tpu.memory_space<vmem>>) attributes {dimension_semantics = [#tpu.dimension_semantics<parallel>], iteration_bounds = array<i64: 1>, scalar_prefetch = 0 : i64, scratch_operands = 0 : i64, tpu.core_type = #tpu.core_type<tc>, window_params = [{transform_indices = @transform_0, window_bounds = array<i64: 16, 16>}, {transform_indices = @transform_1, window_bounds = array<i64: 2, 8>}, {pipeline_mode = #tpu.pipeline_mode<synchronous>, transform_indices = @transform_2, window_bounds = array<i64: 16, 256>}, {pipeline_mode = #tpu.pipeline_mode<synchronous>, transform_indices = @transform_3, window_bounds = array<i64: 128, 128>}, {pipeline_mode = #tpu.pipeline_mode<synchronous>, transform_indices = @transform_4, window_bounds = array<i64: 128, 32>}, {pipeline_mode = #tpu.pipeline_mode<synchronous>, transform_indices = @transform_5, window_bounds = array<i64: 1, 32>}, {pipeline_mode = #tpu.pipeline_mode<synchronous>, transform_indices = @transform_6, window_bounds = array<i64: 1, 32>}, {transform_indices = @transform_7, window_bounds = array<i64: 1>}, {transform_indices = @transform_8, window_bounds = array<i64: 1, 2>}]} {
    %c0 = arith.constant 0 : index
    %c0_0 = arith.constant 0 : index
    %0 = vector.load %arg1[%c0, %c0_0] : memref<16x16xf32, #tpu.memory_space<vmem>>, vector<16x16xf32>
    %c0_1 = arith.constant 0 : index
    %c0_2 = arith.constant 0 : index
    %1 = vector.load %arg3[%c0_1, %c0_2] : memref<16x256xf32, #tpu.memory_space<vmem>>, vector<16x256xf32>
    %cst = arith.constant dense<0.000000e+00> : vector<16x256xf32>
    %2 = tpu.matmul %0, %1, %cst {dimension_numbers = #tpu.dot_dimension_numbers<[1], [0], [0], [1], [0, 0, 1, 1], [], []>} : vector<16x16xf32>, vector<16x256xf32>, vector<16x256xf32> -> vector<16x256xf32>
    %3 = vector.extract_strided_slice %2 {offsets = [0, 0], sizes = [16, 128], strides = [1, 1]} : vector<16x256xf32> to vector<16x128xf32>
    %4 = vector.shape_cast %3 : vector<16x128xf32> to vector<2x8x128xf32>
    %5 = vector.extract_strided_slice %2 {offsets = [0, 128], sizes = [16, 128], strides = [1, 1]} : vector<16x256xf32> to vector<16x128xf32>
    %6 = vector.shape_cast %5 : vector<16x128xf32> to vector<2x8x128xf32>
    %c0_3 = arith.constant 0 : index
    %c0_4 = arith.constant 0 : index
    %7 = vector.load %arg2[%c0_3, %c0_4] : memref<2x8xf32, #tpu.memory_space<vmem>>, vector<2x8xf32>
    %8 = vector.shape_cast %7 : vector<2x8xf32> to vector<2x8x1xf32>
    %cst_5 = arith.constant dense<0xFF800000> : vector<2x128xf32>
    %9 = vector.multi_reduction <maximumf>, %4, %cst_5 [1] : vector<2x8x128xf32> to vector<2x128xf32>
    %10 = vector.shape_cast %9 : vector<2x128xf32> to vector<2x1x128xf32>
    %11 = vector.broadcast %10 : vector<2x1x128xf32> to vector<2x8x128xf32>
    %12 = arith.subf %4, %11 : vector<2x8x128xf32>
    %13 = math.exp %12 : vector<2x8x128xf32>
    %14 = vector.broadcast %8 : vector<2x8x1xf32> to vector<2x8x128xf32>
    %15 = arith.mulf %13, %14 : vector<2x8x128xf32>
    %cst_6 = arith.constant dense<0.000000e+00> : vector<2x128xf32>
    %16 = vector.multi_reduction <add>, %15, %cst_6 [1] : vector<2x8x128xf32> to vector<2x128xf32>
    %17 = vector.shape_cast %16 : vector<2x128xf32> to vector<2x1x128xf32>
    %cst_7 = arith.constant 9.99999997E-7 : f32
    %18 = vector.broadcast %cst_7 : f32 to vector<2x1x128xf32>
    %19 = arith.addf %17, %18 : vector<2x1x128xf32>
    %20 = vector.broadcast %19 : vector<2x1x128xf32> to vector<2x8x128xf32>
    %21 = arith.divf %15, %20 : vector<2x8x128xf32>
    %22 = vector.shape_cast %21 : vector<2x8x128xf32> to vector<16x128xf32>
    %c0_8 = arith.constant 0 : index
    %c0_9 = arith.constant 0 : index
    %23 = vector.load %arg4[%c0_8, %c0_9] : memref<128x128xf32, #tpu.memory_space<vmem>>, vector<128x128xf32>
    %cst_10 = arith.constant dense<0.000000e+00> : vector<16x128xf32>
    %24 = tpu.matmul %22, %23, %cst_10 {dimension_numbers = #tpu.dot_dimension_numbers<[1], [0], [0], [1], [0, 0, 1, 1], [], []>} : vector<16x128xf32>, vector<128x128xf32>, vector<16x128xf32> -> vector<16x128xf32>
    %25 = vector.shape_cast %24 : vector<16x128xf32> to vector<2x8x128xf32>
    %26 = arith.mulf %6, %25 : vector<2x8x128xf32>
    %cst_11 = arith.constant dense<0.000000e+00> : vector<2x128xf32>
    %27 = vector.multi_reduction <add>, %26, %cst_11 [1] : vector<2x8x128xf32> to vector<2x128xf32>
    %c0_12 = arith.constant 0 : index
    %c0_13 = arith.constant 0 : index
    %28 = vector.load %arg5[%c0_12, %c0_13] : memref<128x32xf32, #tpu.memory_space<vmem>>, vector<128x32xf32>
    %cst_14 = arith.constant dense<0.000000e+00> : vector<2x32xf32>
    %29 = tpu.matmul %27, %28, %cst_14 {dimension_numbers = #tpu.dot_dimension_numbers<[1], [0], [0], [1], [0, 0, 1, 1], [], []>} : vector<2x128xf32>, vector<128x32xf32>, vector<2x32xf32> -> vector<2x32xf32>
    %c0_15 = arith.constant 0 : index
    %c0_16 = arith.constant 0 : index
    %30 = vector.load %arg6[%c0_15, %c0_16] : memref<1x32xf32, #tpu.memory_space<vmem>>, vector<1x32xf32>
    %31 = vector.broadcast %30 : vector<1x32xf32> to vector<2x32xf32>
    %32 = arith.addf %29, %31 : vector<2x32xf32>
    %cst_17 = arith.constant 0.000000e+00 : f32
    %33 = vector.broadcast %cst_17 : f32 to vector<2x32xf32>
    %34 = arith.cmpf ogt, %32, %33 : vector<2x32xf32>
    %cst_18 = arith.constant 0.00999999977 : f32
    %35 = vector.broadcast %cst_18 : f32 to vector<2x32xf32>
    %36 = arith.mulf %35, %32 : vector<2x32xf32>
    %37 = arith.select %34, %32, %36 : vector<2x32xi1>, vector<2x32xf32>
    %c0_19 = arith.constant 0 : index
    %c0_20 = arith.constant 0 : index
    %38 = vector.load %arg7[%c0_19, %c0_20] : memref<1x32xf32, #tpu.memory_space<vmem>>, vector<1x32xf32>
    %39 = vector.broadcast %38 : vector<1x32xf32> to vector<2x32xf32>
    %40 = arith.mulf %37, %39 : vector<2x32xf32>
    %cst_21 = arith.constant dense<0.000000e+00> : vector<2xf32>
    %41 = vector.multi_reduction <add>, %40, %cst_21 [1] : vector<2x32xf32> to vector<2xf32>
    %c0_22 = arith.constant 0 : index
    %42 = memref.load %arg8[%c0_22] : memref<1xf32, #tpu.memory_space<smem>>
    %43 = vector.broadcast %42 : f32 to vector<2xf32>
    %44 = arith.addf %41, %43 : vector<2xf32>
    %45 = vector.shape_cast %44 : vector<2xf32> to vector<1x2xf32>
    %c0_23 = arith.constant 0 : index
    %c0_24 = arith.constant 0 : index
    %46 = vector.load %arg9[%c0_23, %c0_24] : memref<1x2xf32, #tpu.memory_space<vmem>>, vector<1x2xf32>
    tpu.vector_store %arg9[%c0_23, %c0_24], %45 {strides = array<i32>} : memref<1x2xf32, #tpu.memory_space<vmem>>, vector<1x2xf32>,
    return
  }
  func.func @transform_0(%arg0: i32) -> (i32, i32) {
    %c0_i32 = arith.constant 0 : i32
    %c0_i32_0 = arith.constant 0 : i32
    return %arg0, %c0_i32 : i32, i32
  }
  func.func @transform_1(%arg0: i32) -> (i32, i32) {
    %c0_i32 = arith.constant 0 : i32
    %c0_i32_0 = arith.constant 0 : i32
    return %arg0, %c0_i32 : i32, i32
  }
  func.func @transform_2(%arg0: i32) -> (i32, i32) {
    %c0_i32 = arith.constant 0 : i32
    %c0_i32_0 = arith.constant 0 : i32
    %c0_i32_1 = arith.constant 0 : i32
    return %c0_i32, %c0_i32_0 : i32, i32
  }
  func.func @transform_3(%arg0: i32) -> (i32, i32) {
    %c0_i32 = arith.constant 0 : i32
    %c0_i32_0 = arith.constant 0 : i32
    %c0_i32_1 = arith.constant 0 : i32
    return %c0_i32, %c0_i32_0 : i32, i32
  }
  func.func @transform_4(%arg0: i32) -> (i32, i32) {
    %c0_i32 = arith.constant 0 : i32
    %c0_i32_0 = arith.constant 0 : i32
    %c0_i32_1 = arith.constant 0 : i32
    return %c0_i32, %c0_i32_0 : i32, i32
  }
  func.func @transform_5(%arg0: i32) -> (i32, i32) {
    %c0_i32 = arith.constant 0 : i32
    %c0_i32_0 = arith.constant 0 : i32
    %c0_i32_1 = arith.constant 0 : i32
    return %c0_i32, %c0_i32_0 : i32, i32
  }
  func.func @transform_6(%arg0: i32) -> (i32, i32) {
    %c0_i32 = arith.constant 0 : i32
    %c0_i32_0 = arith.constant 0 : i32
    %c0_i32_1 = arith.constant 0 : i32
    return %c0_i32, %c0_i32_0 : i32, i32
  }
  func.func @transform_7(%arg0: i32) -> i32 {
    %c0_i32 = arith.constant 0 : i32
    %c0_i32_0 = arith.constant 0 : i32
    return %c0_i32 : i32
  }
  func.func @transform_8(%arg0: i32) -> (i32, i32) {
    %c0_i32 = arith.constant 0 : i32
    %c0_i32_0 = arith.constant 0 : i32
    return %c0_i32, %arg0 : i32, i32
  }
}

module attributes {stable_mosaic.version = 11 : i64} {
  func.func @reward_predictor_kernel(%arg0: i32, %arg1: memref<16x16xf32, #tpu.memory_space<vmem>>, %arg2: memref<2x8xf32, #tpu.memory_space<vmem>>, %arg3: memref<16x256xf32, #tpu.memory_space<vmem>>, %arg4: memref<128x128xf32, #tpu.memory_space<vmem>>, %arg5: memref<128x32xf32, #tpu.memory_space<vmem>>, %arg6: memref<1x32xf32, #tpu.memory_space<vmem>>, %arg7: memref<1x32xf32, #tpu.memory_space<vmem>>, %arg8: memref<1xf32, #tpu.memory_space<smem>>, %arg9: memref<1x2xf32, #tpu.memory_space<vmem>>) attributes {dimension_semantics = [#tpu.dimension_semantics<parallel>], iteration_bounds = array<i64: 1>, scalar_prefetch = 0 : i64, scratch_operands = 0 : i64, tpu.core_type = #tpu.core_type<tc>, window_params = [{transform_indices = @transform_0, window_bounds = array<i64: 16, 16>}, {transform_indices = @transform_1, window_bounds = array<i64: 2, 8>}, {pipeline_mode = #tpu.pipeline_mode<synchronous>, transform_indices = @transform_2, window_bounds = array<i64: 16, 256>}, {pipeline_mode = #tpu.pipeline_mode<synchronous>, transform_indices = @transform_3, window_bounds = array<i64: 128, 128>}, {pipeline_mode = #tpu.pipeline_mode<synchronous>, transform_indices = @transform_4, window_bounds = array<i64: 128, 32>}, {pipeline_mode = #tpu.pipeline_mode<synchronous>, transform_indices = @transform_5, window_bounds = array<i64: 1, 32>}, {pipeline_mode = #tpu.pipeline_mode<synchronous>, transform_indices = @transform_6, window_bounds = array<i64: 1, 32>}, {transform_indices = @transform_7, window_bounds = array<i64: 1>}, {transform_indices = @transform_8, window_bounds = array<i64: 1, 2>}]} {
    %c0 = arith.constant 0 : index
    %c0_0 = arith.constant 0 : index
    %0 = vector.load %arg1[%c0, %c0_0] : memref<16x16xf32, #tpu.memory_space<vmem>>, vector<16x16xf32>
    %c0_1 = arith.constant 0 : index
    %c0_2 = arith.constant 0 : index
    %1 = vector.load %arg3[%c0_1, %c0_2] : memref<16x256xf32, #tpu.memory_space<vmem>>, vector<16x256xf32>
    %cst = arith.constant dense<0.000000e+00> : vector<16x256xf32>
    %2 = tpu.matmul %0, %1, %cst {dimension_numbers = #tpu.dot_dimension_numbers<[1], [0], [0], [1], [0, 0, 1, 1], [], []>} : vector<16x16xf32>, vector<16x256xf32>, vector<16x256xf32> -> vector<16x256xf32>
    %3 = vector.extract_strided_slice %2 {offsets = [0, 0], sizes = [16, 128], strides = [1, 1]} : vector<16x256xf32> to vector<16x128xf32>
    %4 = vector.shape_cast %3 : vector<16x128xf32> to vector<2x8x128xf32>
    %5 = vector.extract_strided_slice %2 {offsets = [0, 128], sizes = [16, 128], strides = [1, 1]} : vector<16x256xf32> to vector<16x128xf32>
    %6 = vector.shape_cast %5 : vector<16x128xf32> to vector<2x8x128xf32>
    %c0_3 = arith.constant 0 : index
    %c0_4 = arith.constant 0 : index
    %7 = vector.load %arg2[%c0_3, %c0_4] : memref<2x8xf32, #tpu.memory_space<vmem>>, vector<2x8xf32>
    %8 = vector.shape_cast %7 : vector<2x8xf32> to vector<2x8x1xf32>
    %cst_5 = arith.constant dense<0xFF800000> : vector<2x128xf32>
    %9 = vector.multi_reduction <maximumf>, %4, %cst_5 [1] : vector<2x8x128xf32> to vector<2x128xf32>
    %10 = vector.shape_cast %9 : vector<2x128xf32> to vector<2x1x128xf32>
    %11 = vector.broadcast %10 : vector<2x1x128xf32> to vector<2x8x128xf32>
    %12 = arith.subf %4, %11 : vector<2x8x128xf32>
    %13 = math.exp %12 : vector<2x8x128xf32>
    %14 = vector.broadcast %8 : vector<2x8x1xf32> to vector<2x8x128xf32>
    %15 = arith.mulf %13, %14 : vector<2x8x128xf32>
    %cst_6 = arith.constant dense<0.000000e+00> : vector<2x128xf32>
    %16 = vector.multi_reduction <add>, %15, %cst_6 [1] : vector<2x8x128xf32> to vector<2x128xf32>
    %17 = vector.shape_cast %16 : vector<2x128xf32> to vector<2x1x128xf32>
    %cst_7 = arith.constant 9.99999997E-7 : f32
    %18 = vector.broadcast %cst_7 : f32 to vector<2x1x128xf32>
    %19 = arith.addf %17, %18 : vector<2x1x128xf32>
    %20 = vector.broadcast %19 : vector<2x1x128xf32> to vector<2x8x128xf32>
    %21 = arith.divf %15, %20 : vector<2x8x128xf32>
    %22 = vector.shape_cast %21 : vector<2x8x128xf32> to vector<16x128xf32>
    %c0_8 = arith.constant 0 : index
    %c0_9 = arith.constant 0 : index
    %23 = vector.load %arg4[%c0_8, %c0_9] : memref<128x128xf32, #tpu.memory_space<vmem>>, vector<128x128xf32>
    %cst_10 = arith.constant dense<0.000000e+00> : vector<16x128xf32>
    %24 = tpu.matmul %22, %23, %cst_10 {dimension_numbers = #tpu.dot_dimension_numbers<[1], [0], [0], [1], [0, 0, 1, 1], [], []>} : vector<16x128xf32>, vector<128x128xf32>, vector<16x128xf32> -> vector<16x128xf32>
    %25 = vector.shape_cast %24 : vector<16x128xf32> to vector<2x8x128xf32>
    %26 = arith.mulf %6, %25 : vector<2x8x128xf32>
    %cst_11 = arith.constant dense<0.000000e+00> : vector<2x128xf32>
    %27 = vector.multi_reduction <add>, %26, %cst_11 [1] : vector<2x8x128xf32> to vector<2x128xf32>
    %c0_12 = arith.constant 0 : index
    %c0_13 = arith.constant 0 : index
    %28 = vector.load %arg5[%c0_12, %c0_13] : memref<128x32xf32, #tpu.memory_space<vmem>>, vector<128x32xf32>
    %cst_14 = arith.constant dense<0.000000e+00> : vector<2x32xf32>
    %29 = tpu.matmul %27, %28, %cst_14 {dimension_numbers = #tpu.dot_dimension_numbers<[1], [0], [0], [1], [0, 0, 1, 1], [], []>} : vector<2x128xf32>, vector<128x32xf32>, vector<2x32xf32> -> vector<2x32xf32>
    %c0_15 = arith.constant 0 : index
    %c0_16 = arith.constant 0 : index
    %30 = vector.load %arg6[%c0_15, %c0_16] : memref<1x32xf32, #tpu.memory_space<vmem>>, vector<1x32xf32>
    %31 = vector.broadcast %30 : vector<1x32xf32> to vector<2x32xf32>
    %32 = arith.addf %29, %31 : vector<2x32xf32>
    %cst_17 = arith.constant 0.000000e+00 : f32
    %33 = vector.broadcast %cst_17 : f32 to vector<2x32xf32>
    %34 = arith.cmpf ogt, %32, %33 : vector<2x32xf32>
    %cst_18 = arith.constant 0.00999999977 : f32
    %35 = vector.broadcast %cst_18 : f32 to vector<2x32xf32>
    %36 = arith.mulf %35, %32 : vector<2x32xf32>
    %37 = arith.select %34, %32, %36 : vector<2x32xi1>, vector<2x32xf32>
    %c0_19 = arith.constant 0 : index
    %c0_20 = arith.constant 0 : index
    %38 = vector.load %arg7[%c0_19, %c0_20] : memref<1x32xf32, #tpu.memory_space<vmem>>, vector<1x32xf32>
    %39 = vector.broadcast %38 : vector<1x32xf32> to vector<2x32xf32>
    %40 = arith.mulf %37, %39 : vector<2x32xf32>
    %cst_21 = arith.constant dense<0.000000e+00> : vector<2xf32>
    %41 = vector.multi_reduction <add>, %40, %cst_21 [1] : vector<2x32xf32> to vector<2xf32>
    %c0_22 = arith.constant 0 : index
    %42 = memref.load %arg8[%c0_22] : memref<1xf32, #tpu.memory_space<smem>>
    %43 = vector.broadcast %42 : f32 to vector<2xf32>
    %44 = arith.addf %41, %43 : vector<2xf32>
    %45 = vector.shape_cast %44 : vector<2xf32> to vector<1x2xf32>
    %c0_23 = arith.constant 0 : index
    %c0_24 = arith.constant 0 : index
    %46 = vector.load %arg9[%c0_23, %c0_24] : memref<1x2xf32, #tpu.memory_space<vmem>>, vector<1x2xf32>
    tpu.vector_store %arg9[%c0_23, %c0_24], %45 {strides = array<i32>} : memref<1x2xf32, #tpu.memory_space<vmem>>, vector<1x2xf32>,
    return
  }
  func.func @transform_0(%arg0: i32) -> (i32, i32) {
    %c0_i32 = arith.constant 0 : i32
    %c0_i32_0 = arith.constant 0 : i32
    return %arg0, %c0_i32 : i32, i32
  }
  func.func @transform_1(%arg0: i32) -> (i32, i32) {
    %c0_i32 = arith.constant 0 : i32
    %c0_i32_0 = arith.constant 0 : i32
    return %arg0, %c0_i32 : i32, i32
  }
  func.func @transform_2(%arg0: i32) -> (i32, i32) {
    %c0_i32 = arith.constant 0 : i32
    %c0_i32_0 = arith.constant 0 : i32
    %c0_i32_1 = arith.constant 0 : i32
    return %c0_i32, %c0_i32_0 : i32, i32
  }
  func.func @transform_3(%arg0: i32) -> (i32, i32) {
    %c0_i32 = arith.constant 0 : i32
    %c0_i32_0 = arith.constant 0 : i32
    %c0_i32_1 = arith.constant 0 : i32
    return %c0_i32, %c0_i32_0 : i32, i32
  }
  func.func @transform_4(%arg0: i32) -> (i32, i32) {
    %c0_i32 = arith.constant 0 : i32
    %c0_i32_0 = arith.constant 0 : i32
    %c0_i32_1 = arith.constant 0 : i32
    return %c0_i32, %c0_i32_0 : i32, i32
  }
  func.func @transform_5(%arg0: i32) -> (i32, i32) {
    %c0_i32 = arith.constant 0 : i32
    %c0_i32_0 = arith.constant 0 : i32
    %c0_i32_1 = arith.constant 0 : i32
    return %c0_i32, %c0_i32_0 : i32, i32
  }
  func.func @transform_6(%arg0: i32) -> (i32, i32) {
    %c0_i32 = arith.constant 0 : i32
    %c0_i32_0 = arith.constant 0 : i32
    %c0_i32_1 = arith.constant 0 : i32
    return %c0_i32, %c0_i32_0 : i32, i32
  }
  func.func @transform_7(%arg0: i32) -> i32 {
    %c0_i32 = arith.constant 0 : i32
    %c0_i32_0 = arith.constant 0 : i32
    return %c0_i32 : i32
  }
  func.func @transform_8(%arg0: i32) -> (i32, i32) {
    %c0_i32 = arith.constant 0 : i32
    %c0_i32_0 = arith.constant 0 : i32
    return %c0_i32, %arg0 : i32, i32
  }
}

</mosaic_0001>

<bundles_post_ra>
// kernel: _run_kernel.1
= control target key start
LH: loop header
LB: loop body
LE: loop exit
PB: predicated region body
PF: predicated region fallthrough
CT: control target
= control target key end

     0   :  { %14 = vsyncpa [#allocation4], 0  ;;  %s886_s0 = inlined_call_operand.hbm [shape: f32[16,16], index: 0, kind: input, shape index: {}]   ;;  %s887_s1 = inlined_call_operand.vmem [shape: f32[2,8], index: 1, kind: input, shape index: {}]   ;;  %s888_s2 = inlined_call_operand.vmem [shape: f32[16,256], index: 2, kind: input, shape index: {}]   ;;  %s889_s3 = inlined_call_operand.vmem [shape: f32[128,128], index: 3, kind: input, shape index: {}]   ;;  %s890_s4 = inlined_call_operand.vmem [shape: f32[128,32], index: 4, kind: input, shape index: {}]   ;;  %s891_s5 = inlined_call_operand.vmem [shape: f32[1,32], index: 5, kind: input, shape index: {}]   ;;  %s892_s6 = inlined_call_operand.vmem [shape: f32[1,32], index: 6, kind: input, shape index: {}]   ;;  %s893_s7 = inlined_call_operand.<no memory space> [shape: f32[1], index: 7, kind: input, shape index: {}]   ;;  %s894_s8 = inlined_call_operand.hbm [shape: f32[1,2], index: 8, kind: output, shape index: {}]  }
   0x1   :  { %15 = vsyncpa [#allocation5], 0  ;;  %s666_s27 = smov [#allocation3]   ;;  %s618_s9 = scalar_lea.hbm %s886_s0, 256 }
   0x2   :  { %s21_s28 = sshll.u32 %s666_s27, 4  ;;  %p619_p0 = scmp.ne.s32.totalorder %s886_s0, %s618_s9  ;;  %s22_s28 = int_to_ptr.vmem [resolvable:$true] %s21_s28 }
   0x3   :  { %p622_p1 = scmp.lt.u32.totalorder %s618_s9, %s886_s0 }
   0x5   :  { %p624_p2 = pnand %p622_p1, %p619_p0 }
   0x7   :  { %627 = shalt.err (!%p624_p2)
}
   0x8   :  { %s628_s14 = scalar_lea.vmem %s22_s28, 256  ;;  %p633_p4 = scmp.lt.s32.totalorder %s22_s28, %s22_s28 }
   0x9   :  { %p629_p3 = scmp.ne.s32.totalorder %s22_s28, %s628_s14  ;;  %p634_p5 = scmp.lt.s32.totalorder %s628_s14, %s628_s14 }
   0xb   :  { %p635_p6 = por %p634_p5, %p633_p4 }
   0xd   :  { %p636_p7 = pnand %p635_p6, %p629_p3 }
   0xf   :  { %639 = shalt.err (!%p636_p7)
}
  0x10   :  { %s667_s15 = smov 128   ;;  %s668_s16 = smov 8  }
  0x11   :  { %27 = dma.hbm_to_vmem [thread:$0]  %s886_s0, 256, %s22_s28, [#allocation4], %s667_s15, %s667_s15, %s668_s16  }
  0x12   :  { %662 = dma.done.wait [#allocation4], 256  }
  0x13   :  { %663 = vsyncadd [#allocation4], 4294967040  ;;  %v136_v0 = vlaneseq  ;;  %v669_v1 = vmov 0.0   ;;  %v48_v4 = vld [vmem:[%s888_s2 + $0x8] sm:$0xff]  ;;  %v50_v5 = vld [vmem:[%s888_s2 + $0x18] sm:$0xff]  ;;  %vm51_vm0 = vcmask 130048  }
  0x14   :  { %122 = vmatprep.mubr.f32.mxu0 %v669_v1  ;;  %v47_v6 = vld [vmem:[%s888_s2] sm:$0xff]  ;;  %v543_v7 = vpack.c.bf16 %v50_v5, %v48_v4  ;;  %v49_v8 = vld [vmem:[%s888_s2 + $0x10] sm:$0xff]  ;;  %v46_v15 = vld [vmem:[#allocation3 + $0x8] sm:$0xff]  ;;  %v670_v43 = vmov 0.0|0.0   ;;  %vm671_vm1 = vmmov 0   ;;  %vm318_vm2 = vcmask 1041409  }
  0x15   :  { %v732_v2 = vshrl.u32 %v136_v0, 7  ;;  %v545_v10 = vpack.c.bf16 %v49_v8, %v47_v6  ;;  %v135_v11 = vld [vmem:[%s887_s1] sm:$0x3]  ;;  %v189_v17 = vld [vmem:[%s889_s3 + $0x8] sm:$0xff]  ;;  %v190_v19 = vld [vmem:[%s889_s3 + $0x10] sm:$0xff]  ;;  %vm402_vm4 = vcmask 254976  }
  0x16   :  { %544 = vmatprep.subr.bf16.mxu0 %v543_v7  ;;  %v45_v13 = vld [vmem:[#allocation3] sm:$0xff]  ;;  %v191_v20 = vld [vmem:[%s889_s3 + $0x18] sm:$0xff]  ;;  %v193_v23 = vld [vmem:[%s889_s3 + $0x28] sm:$0xff]  ;;  %vm417_vm5 = vcmask 8192  }
  0x17   :  { %v138_v3 = vsub.s32 0, %v732_v2  ;;  %v145_v9 = vsub.s32 1, %v732_v2  ;;  %546 = vmatpush1.bf16.msra.mxu0 %v545_v10  ;;  %v188_v16 = vld [vmem:[%s889_s3] sm:$0xff]  ;;  %v551_v21 = vpack.c.bf16 %v191_v20, %v190_v19  ;;  %v194_v25 = vld [vmem:[%s889_s3 + $0x30] sm:$0xff]  ;;  %v195_v26 = vld [vmem:[%s889_s3 + $0x38] sm:$0xff] }
  0x18   :  { %v547_v18 = vpack.c.bf16 %v189_v17, %v188_v16  ;;  %v192_v22 = vld [vmem:[%s889_s3 + $0x20] sm:$0xff]  ;;  %v559_v27 = vpack.c.bf16 %v195_v26, %v194_v25  ;;  %v197_v29 = vld [vmem:[%s889_s3 + $0x48] sm:$0xff]  ;;  %v198_v31 = vld [vmem:[%s889_s3 + $0x50] sm:$0xff]  ;;  %579 = vmatprep.subr.bf16.mxu0 %v670_v43 }
  0x19   :  { %v139_v12 = vrot.slane %v135_v11, %v138_v3  ;;  %v146_v14 = vrot.slane %v135_v11, %v145_v9  ;;  %v555_v24 = vpack.c.bf16 %v193_v23, %v192_v22  ;;  %v196_v28 = vld [vmem:[%s889_s3 + $0x40] sm:$0xff]  ;;  %v199_v32 = vld [vmem:[%s889_s3 + $0x58] sm:$0xff]  ;;  %v201_v35 = vld [vmem:[%s889_s3 + $0x68] sm:$0xff] }
  0x1a   :  { %434 = vmatmul.mubr.msk.f32.vlgmr.msra.gmra.mrb[0].mxu0 %vm51_vm0, %v45_v13  ;;  %548 = vmatprep.subr.bf16.mxu1 %v547_v18  ;;  %v563_v30 = vpack.c.bf16 %v197_v29, %v196_v28  ;;  %v567_v33 = vpack.c.bf16 %v199_v32, %v198_v31  ;;  %v200_v34 = vld [vmem:[%s889_s3 + $0x60] sm:$0xff]  ;;  %v202_v36 = vld [vmem:[%s889_s3 + $0x70] sm:$0xff]  ;;  %v203_v38 = vld [vmem:[%s889_s3 + $0x78] sm:$0xff] }
  0x1b   :  { %141 = vbcast.lane.b32.xlu0 %v139_v12, 256  ;;  %128 = vmatprep.mubr.f32.mxu0 %v669_v1  ;;  %v571_v37 = vpack.c.bf16 %v201_v35, %v200_v34  ;;  %v575_v39 = vpack.c.bf16 %v203_v38, %v202_v36  ;;  %v293_v40 = vld [vmem:[%s890_s4] sm:$0xff]  ;;  %v294_v41 = vld [vmem:[%s890_s4 + $0x8] sm:$0xff]  ;;  %v295_v42 = vld [vmem:[%s890_s4 + $0x10] sm:$0xff] }
  0x1c   :  { %550 = vmatpush3.bf16.msra.mxu1 %v547_v18  ;;  %v580_v44 = vpack.c.bf16 %v294_v41, %v293_v40  ;;  %v296_v45 = vld [vmem:[%s890_s4 + $0x18] sm:$0xff]  ;;  %v297_v47 = vld [vmem:[%s890_s4 + $0x20] sm:$0xff]  ;;  %v298_v48 = vld [vmem:[%s890_s4 + $0x28] sm:$0xff] }
  0x1d   :  { %552 = vmatprep.subr.bf16.mxu1 %v551_v21  ;;  %v583_v46 = vpack.c.bf16 %v296_v45, %v295_v42  ;;  %v586_v49 = vpack.c.bf16 %v298_v48, %v297_v47  ;;  %v299_v50 = vld [vmem:[%s890_s4 + $0x30] sm:$0xff]  ;;  %v300_v51 = vld [vmem:[%s890_s4 + $0x38] sm:$0xff]  ;;  %v301_v36 = vld [vmem:[%s890_s4 + $0x40] sm:$0xff] }
  0x1e   :  { %435 = vmatmul.mubr.msk.f32.gmra.mrb[2].mxu0 %vm51_vm0, %v46_v15  ;;  %v589_v52 = vpack.c.bf16 %v300_v51, %v299_v50  ;;  %v304_v40 = vld [vmem:[%s890_s4 + $0x58] sm:$0xff]  ;;  %v305_v42 = vld [vmem:[%s890_s4 + $0x60] sm:$0xff] }
  0x1f   :  { %148 = vbcast.lane.b32.xlu0 %v146_v14, 256  ;;  %581 = vmatpush3.bf16.msra.mxu0 %v580_v44  ;;  %v306_v44 = vld [vmem:[%s890_s4 + $0x68] sm:$0xff]  ;;  %v308_v47 = vld [vmem:[%s890_s4 + $0x78] sm:$0xff] }
  0x20   :  { %554 = vmatpush3.bf16.msra.mxu1 %v551_v21  ;;  %582 = vmatprep.subr.bf16.mxu0 %v670_v43  ;;  %v598_v45 = vpack.c.bf16 %v306_v44, %v305_v42 }
  0x21   :  { %556 = vmatprep.subr.bf16.mxu1 %v555_v24  ;;  %540 = vmatprep.mubr.msk.f32.mxu0 %vm671_vm1, %v669_v1 }
  0x23   :  { %584 = vmatpush3.bf16.msra.mxu0 %v583_v46  ;;  %v307_v46 = vld [vmem:[%s890_s4 + $0x70] sm:$0xff] }
  0x24   :  { %558 = vmatpush3.bf16.msra.mxu1 %v555_v24  ;;  %585 = vmatprep.subr.bf16.mxu0 %v670_v43  ;;  %v601_v48 = vpack.c.bf16 %v308_v47, %v307_v46 }
  0x25   :  { %560 = vmatprep.subr.bf16.mxu1 %v559_v27 }
  0x27   :  { %587 = vmatpush3.bf16.msra.mxu0 %v586_v49 }
  0x28   :  { %562 = vmatpush3.bf16.msra.mxu1 %v559_v27  ;;  %588 = vmatprep.subr.bf16.mxu0 %v670_v43 }
  0x29   :  { %564 = vmatprep.subr.bf16.mxu1 %v563_v30 }
  0x2b   :  { %590 = vmatpush3.bf16.msra.mxu0 %v589_v52 }
  0x2c   :  { %566 = vmatpush3.bf16.msra.mxu1 %v563_v30  ;;  %591 = vmatprep.subr.bf16.mxu0 %v670_v43 }
  0x2d   :  { %568 = vmatprep.subr.bf16.mxu1 %v567_v33 }
  0x30   :  { %570 = vmatpush3.bf16.msra.mxu1 %v567_v33 }
  0x31   :  { %572 = vmatprep.subr.bf16.mxu1 %v571_v37 }
  0x34   :  { %574 = vmatpush3.bf16.msra.mxu1 %v571_v37  ;;  %v302_v37 = vld [vmem:[%s890_s4 + $0x48] sm:$0xff] }
  0x35   :  { %576 = vmatprep.subr.bf16.mxu1 %v575_v39  ;;  %v592_v38 = vpack.c.bf16 %v302_v37, %v301_v36 }
  0x37   :  { %593 = vmatpush3.bf16.msra.mxu0 %v592_v38 }
  0x38   :  { %578 = vmatpush3.bf16.msra.mxu1 %v575_v39  ;;  %594 = vmatprep.subr.bf16.mxu0 %v670_v43  ;;  %v303_v39 = vld [vmem:[%s890_s4 + $0x50] sm:$0xff] }
  0x39   :  { %v595_v41 = vpack.c.bf16 %v304_v40, %v303_v39 }
  0x3b   :  { %596 = vmatpush3.bf16.msra.mxu0 %v595_v41 }
  0x3c   :  { %597 = vmatprep.subr.bf16.mxu0 %v670_v43 }
  0x3f   :  { %599 = vmatpush3.bf16.msra.mxu0 %v598_v45 }
  0x40   :  { %600 = vmatprep.subr.bf16.mxu0 %v670_v43 }
  0x43   :  { %602 = vmatpush3.bf16.msra.mxu0 %v601_v48 }
  0x8d   :  { %v142_v12 = vpop.permute.xlu0 %141 }
  0x91   :  { %v149_v15 = vpop.permute.xlu0 %148 }
  0xed   :  { %v124_v53 = vpop.f32.mrb[0].mxu0 }
  0xee   :  { %v150_v54 = vrot.slane %v124_v53, 4  ;;  %v829_v55 = vpop.f32.mrb[1].mxu0 }
  0xf0   :  { %v151_v56 = vmax.f32 %v124_v53, %v150_v54 }
  0xf1   :  { %v130_v57 = vpop.f32.mrb[2].mxu0 }
  0xf2   :  { %v152_v58 = vrot.slane %v151_v56, 2  ;;  %v156_v59 = vrot.slane %v130_v57, 4  ;;  %v831_v60 = vpop.f32.mrb[3].mxu0 }
  0xf4   :  { %v153_v61 = vmax.f32 %v151_v56, %v152_v58  ;;  %v157_v62 = vmax.f32 %v130_v57, %v156_v59 }
  0xf6   :  { %v154_v63 = vrot.slane %v153_v61, 1  ;;  %v158_v3 = vrot.slane %v157_v62, 2 }
  0xf8   :  { %v155_v4 = vmax.f32 %v153_v61, %v154_v63  ;;  %v159_v5 = vmax.f32 %v157_v62, %v158_v3 }
  0xfa   :  { %v162_v6 = vsub.f32 %v124_v53, %v155_v4  ;;  %v160_v7 = vrot.slane %v159_v5, 1 }
  0xfc   :  { %v164_v8 = vmul.f32 1.442695, %v162_v6  ;;  %v161_v9 = vmax.f32 %v159_v5, %v160_v7 }
  0xfe   :  { %610 = vpow2.f32 %v164_v8  ;;  %v163_v10 = vsub.f32 %v130_v57, %v161_v9  ;;  %v437_v8 = vld [vmem:[%s892_s6] ss:$0 sm:$0xff] }
 0x100   :  { %v166_v11 = vmul.f32 1.442695, %v163_v10 }
 0x102   :  { %612 = vpow2.f32 %v166_v11 }
 0x108   :  { %v611_v13 = vpop.eup %610 }
 0x109   :  { %v168_v14 = vmul.f32 %v611_v13, %v142_v12  ;;  %v411_v12 = vand.u32 127, %v136_v0  ;;  %v407_v13 = vstv %s893_s7 }
 0x10b   :  { %v170_v16 = vrot.slane %v168_v14, 4 }
 0x10c   :  { %v613_v17 = vpop.eup %612 }
 0x10d   :  { %v171_v18 = vadd.f32 %v170_v16, %v168_v14  ;;  %v169_v19 = vmul.f32 %v613_v17, %v149_v15 }
 0x10f   :  { %v172_v20 = vrot.slane %v171_v18, 2  ;;  %v176_v21 = vrot.slane %v169_v19, 4 }
 0x111   :  { %v173_v22 = vadd.f32 %v172_v20, %v171_v18  ;;  %v177_v23 = vadd.f32 %v176_v21, %v169_v19 }
 0x113   :  { %v174_v24 = vrot.slane %v173_v22, 1  ;;  %v178_v25 = vrot.slane %v177_v23, 2 }
 0x115   :  { %v175_v26 = vadd.f32 %v174_v24, %v173_v22  ;;  %v179_v27 = vadd.f32 %v178_v25, %v177_v23 }
 0x117   :  { %v182_v28 = vadd.f32 1e-06, %v175_v26  ;;  %v180_v29 = vrot.slane %v179_v27, 1 }
 0x119   :  { %614 = vrcp.f32 %v182_v28  ;;  %v181_v30 = vadd.f32 %v180_v29, %v179_v27 }
 0x11b   :  { %v183_v31 = vadd.f32 1e-06, %v181_v30 }
 0x11d   :  { %616 = vrcp.f32 %v183_v31 }
 0x123   :  { %v615_v32 = vpop.eup %614 }
 0x124   :  { %v185_v33 = vmul.f32 %v615_v32, %v168_v14  ;;  %v414_v14 = vsub.s32 %v411_v12, %v732_v2 }
 0x126   :  { %505 = vmatprep.mubr.f32.mxu1 %v185_v33 }
 0x127   :  { %v617_v34 = vpop.eup %616 }
 0x128   :  { %v187_v35 = vmul.f32 %v617_v34, %v169_v19 }
 0x12a   :  { %506 = vmatmul.mubr.f32.vlgmr.msra.gmra.mrb[0].mxu1 %v187_v35 }
 0x1fd   :  { %v507_v49 = vpop.f32.mrb[0].mxu1 }
 0x1fe   :  { %v280_v50 = vmul.f32 %v507_v49, %v831_v60  ;;  %v270_v51 = vpop.f32.mrb[1].mxu1  ;;  %v436_v60 = vld [vmem:[%s891_s5] ss:$0 sm:$0xff]  ;;  %s672_s5 = smov [#allocation6]  }
 0x1ff   :  { %v279_v52 = vmul.f32 %v270_v51, %v829_v55  ;;  %s425_s21 = sshll.u32 %s672_s5, 4  ;;  %s426_s21 = int_to_ptr.vmem [resolvable:$true] %s425_s21 }
 0x200   :  { %v287_v43 = vrot.slane %v280_v50, 4  ;;  %s640_s6 = scalar_lea.vmem %s426_s21, 16  ;;  %s644_s22 = scalar_lea.vmem %s426_s21, 32 }
 0x201   :  { %v281_v53 = vrot.slane %v279_v52, 4  ;;  %p641_p8 = scmp.ne.s32.totalorder %s426_s21, %s640_s6  ;;  %p645_p9 = scmp.lt.s32.totalorder %s426_s21, %s426_s21 }
 0x202   :  { %v288_v54 = vadd.f32 %v287_v43, %v280_v50  ;;  %p646_p10 = scmp.lt.s32.totalorder %s644_s22, %s640_s6 }
 0x203   :  { %v282_v56 = vadd.f32 %v281_v53, %v279_v52 }
 0x204   :  { %v289_v57 = vrot.slane %v288_v54, 2  ;;  %p647_p11 = por %p646_p10, %p645_p9 }
 0x205   :  { %v283_v58 = vrot.slane %v282_v56, 2 }
 0x206   :  { %v290_v59 = vadd.f32 %v289_v57, %v288_v54  ;;  %p648_p12 = pnand %p647_p11, %p641_p8 }
 0x207   :  { %v284_v61 = vadd.f32 %v283_v58, %v282_v56 }
 0x208   :  { %v291_v62 = vrot.slane %v290_v59, 1 }
 0x209   :  { %v285_v63 = vrot.slane %v284_v61, 1 }
 0x20a   :  { %v292_v3 = vadd.f32 %v291_v62, %v290_v59 }
 0x20b   :  { %v286_v4 = vadd.f32 %v285_v63, %v284_v61 }
 0x20d   :  { %v319_v1 = vsel %vm318_vm2, %v292_v3, %v286_v4 }
 0x20e   :  { %541 = vmatmul.mubr.f32.vlgmr.msra.gmra.mrb[4].mxu0 %v319_v1 }
 0x2e1   :  { %v387_v55 = vpop.f32.mrb[4].mxu0 }
 0x2e2   :  { %v388_v5 = vadd.f32 %v436_v60, %v387_v55  ;;  %v542_v6 = vpop.f32.mrb[5].mxu0 }
 0x2e4   :  { %v392_v7 = vmul.f32 0.01, %v388_v5  ;;  %vm391_vm3 = vcmp.gt.f32.partialorder %v388_v5, 0.0 }
 0x2e6   :  { %v393_v9 = vsel %vm391_vm3, %v388_v5, %v392_v7 }
 0x2e7   :  { %v401_v10 = vmul.f32 %v437_v8, %v393_v9 }
 0x2e9   :  { %v403_v11 = vsel %vm402_vm4, %v401_v10, 0.0 }
 0x2ea   :  { %404 = vadd.xlane.f32.xlu1 %v403_v11 }
 0x377   :  { %v405_v15 = vpop.xlane.xlu1 %404 }
 0x378   :  { %v408_v16 = vadd.f32 %v407_v13, %v405_v15 }
 0x37a   :  { %v415_v17 = vrot.slane %v408_v16, %v414_v14 }
 0x37c   :  { %418 = vst.msk [vmem:[#allocation6] sm:$0x1] %vm417_vm5, %v415_v17 }
 0x37d   :  { %651 = shalt.err (!%p648_p12)
}
 0x37e   :  { %s652_s23 = scalar_lea.hbm %s894_s8, 16 }
 0x37f   :  { %p653_p13 = scmp.ne.s32.totalorder %s894_s8, %s652_s23  ;;  %p656_p0 = scmp.lt.u32.totalorder %s652_s23, %s894_s8 }
 0x381   :  { %p658_p1 = pnand %p656_p0, %p653_p13 }
 0x383   :  { %661 = shalt.err (!%p658_p1)
}
 0x384   :  { %428 = dma.vmem_to_hbm [thread:$0]  %s426_s21, 16, %s894_s8, [#allocation5]  }
 0x385   :  { %664 = dma.done.wait [#allocation5], 16  }
 0x386   :  { %665 = vsyncadd [#allocation5], 4294967280 }
 0x387   :  { %432 = vsyncpa [#allocation4], 1 }
 0x388   :  { %433 = vsyncpa [#allocation5], 1 }

// kernel: _run_kernel.1
= control target key start
LH: loop header
LB: loop body
LE: loop exit
PB: predicated region body
PF: predicated region fallthrough
CT: control target
= control target key end

     0   :  { %14 = vsyncpa [#allocation4], 0  ;;  %s886_s0 = inlined_call_operand.hbm [shape: f32[16,16], index: 0, kind: input, shape index: {}]   ;;  %s887_s1 = inlined_call_operand.vmem [shape: f32[2,8], index: 1, kind: input, shape index: {}]   ;;  %s888_s2 = inlined_call_operand.vmem [shape: f32[16,256], index: 2, kind: input, shape index: {}]   ;;  %s889_s3 = inlined_call_operand.vmem [shape: f32[128,128], index: 3, kind: input, shape index: {}]   ;;  %s890_s4 = inlined_call_operand.vmem [shape: f32[128,32], index: 4, kind: input, shape index: {}]   ;;  %s891_s5 = inlined_call_operand.vmem [shape: f32[1,32], index: 5, kind: input, shape index: {}]   ;;  %s892_s6 = inlined_call_operand.vmem [shape: f32[1,32], index: 6, kind: input, shape index: {}]   ;;  %s893_s7 = inlined_call_operand.<no memory space> [shape: f32[1], index: 7, kind: input, shape index: {}]   ;;  %s894_s8 = inlined_call_operand.hbm [shape: f32[1,2], index: 8, kind: output, shape index: {}]  }
   0x1   :  { %15 = vsyncpa [#allocation5], 0  ;;  %s666_s27 = smov [#allocation3]   ;;  %s618_s9 = scalar_lea.hbm %s886_s0, 256 }
   0x2   :  { %s21_s28 = sshll.u32 %s666_s27, 4  ;;  %p619_p0 = scmp.ne.s32.totalorder %s886_s0, %s618_s9  ;;  %s22_s28 = int_to_ptr.vmem [resolvable:$true] %s21_s28 }
   0x3   :  { %p622_p1 = scmp.lt.u32.totalorder %s618_s9, %s886_s0 }
   0x5   :  { %p624_p2 = pnand %p622_p1, %p619_p0 }
   0x7   :  { %627 = shalt.err (!%p624_p2)
}
   0x8   :  { %s628_s14 = scalar_lea.vmem %s22_s28, 256  ;;  %p633_p4 = scmp.lt.s32.totalorder %s22_s28, %s22_s28 }
   0x9   :  { %p629_p3 = scmp.ne.s32.totalorder %s22_s28, %s628_s14  ;;  %p634_p5 = scmp.lt.s32.totalorder %s628_s14, %s628_s14 }
   0xb   :  { %p635_p6 = por %p634_p5, %p633_p4 }
   0xd   :  { %p636_p7 = pnand %p635_p6, %p629_p3 }
   0xf   :  { %639 = shalt.err (!%p636_p7)
}
  0x10   :  { %s667_s15 = smov 128   ;;  %s668_s16 = smov 8  }
  0x11   :  { %27 = dma.hbm_to_vmem [thread:$0]  %s886_s0, 256, %s22_s28, [#allocation4], %s667_s15, %s667_s15, %s668_s16  }
  0x12   :  { %662 = dma.done.wait [#allocation4], 256  }
  0x13   :  { %663 = vsyncadd [#allocation4], 4294967040  ;;  %v136_v0 = vlaneseq  ;;  %v669_v1 = vmov 0.0   ;;  %v48_v4 = vld [vmem:[%s888_s2 + $0x8] sm:$0xff]  ;;  %v50_v5 = vld [vmem:[%s888_s2 + $0x18] sm:$0xff]  ;;  %vm51_vm0 = vcmask 130048  }
  0x14   :  { %122 = vmatprep.mubr.f32.mxu0 %v669_v1  ;;  %v47_v6 = vld [vmem:[%s888_s2] sm:$0xff]  ;;  %v543_v7 = vpack.c.bf16 %v50_v5, %v48_v4  ;;  %v49_v8 = vld [vmem:[%s888_s2 + $0x10] sm:$0xff]  ;;  %v46_v15 = vld [vmem:[#allocation3 + $0x8] sm:$0xff]  ;;  %v670_v43 = vmov 0.0|0.0   ;;  %vm671_vm1 = vmmov 0   ;;  %vm318_vm2 = vcmask 1041409  }
  0x15   :  { %v732_v2 = vshrl.u32 %v136_v0, 7  ;;  %v545_v10 = vpack.c.bf16 %v49_v8, %v47_v6  ;;  %v135_v11 = vld [vmem:[%s887_s1] sm:$0x3]  ;;  %v189_v17 = vld [vmem:[%s889_s3 + $0x8] sm:$0xff]  ;;  %v190_v19 = vld [vmem:[%s889_s3 + $0x10] sm:$0xff]  ;;  %vm402_vm4 = vcmask 254976  }
  0x16   :  { %544 = vmatprep.subr.bf16.mxu0 %v543_v7  ;;  %v45_v13 = vld [vmem:[#allocation3] sm:$0xff]  ;;  %v191_v20 = vld [vmem:[%s889_s3 + $0x18] sm:$0xff]  ;;  %v193_v23 = vld [vmem:[%s889_s3 + $0x28] sm:$0xff]  ;;  %vm417_vm5 = vcmask 8192  }
  0x17   :  { %v138_v3 = vsub.s32 0, %v732_v2  ;;  %v145_v9 = vsub.s32 1, %v732_v2  ;;  %546 = vmatpush1.bf16.msra.mxu0 %v545_v10  ;;  %v188_v16 = vld [vmem:[%s889_s3] sm:$0xff]  ;;  %v551_v21 = vpack.c.bf16 %v191_v20, %v190_v19  ;;  %v194_v25 = vld [vmem:[%s889_s3 + $0x30] sm:$0xff]  ;;  %v195_v26 = vld [vmem:[%s889_s3 + $0x38] sm:$0xff] }
  0x18   :  { %v547_v18 = vpack.c.bf16 %v189_v17, %v188_v16  ;;  %v192_v22 = vld [vmem:[%s889_s3 + $0x20] sm:$0xff]  ;;  %v559_v27 = vpack.c.bf16 %v195_v26, %v194_v25  ;;  %v197_v29 = vld [vmem:[%s889_s3 + $0x48] sm:$0xff]  ;;  %v198_v31 = vld [vmem:[%s889_s3 + $0x50] sm:$0xff]  ;;  %579 = vmatprep.subr.bf16.mxu0 %v670_v43 }
  0x19   :  { %v139_v12 = vrot.slane %v135_v11, %v138_v3  ;;  %v146_v14 = vrot.slane %v135_v11, %v145_v9  ;;  %v555_v24 = vpack.c.bf16 %v193_v23, %v192_v22  ;;  %v196_v28 = vld [vmem:[%s889_s3 + $0x40] sm:$0xff]  ;;  %v199_v32 = vld [vmem:[%s889_s3 + $0x58] sm:$0xff]  ;;  %v201_v35 = vld [vmem:[%s889_s3 + $0x68] sm:$0xff] }
  0x1a   :  { %434 = vmatmul.mubr.msk.f32.vlgmr.msra.gmra.mrb[0].mxu0 %vm51_vm0, %v45_v13  ;;  %548 = vmatprep.subr.bf16.mxu1 %v547_v18  ;;  %v563_v30 = vpack.c.bf16 %v197_v29, %v196_v28  ;;  %v567_v33 = vpack.c.bf16 %v199_v32, %v198_v31  ;;  %v200_v34 = vld [vmem:[%s889_s3 + $0x60] sm:$0xff]  ;;  %v202_v36 = vld [vmem:[%s889_s3 + $0x70] sm:$0xff]  ;;  %v203_v38 = vld [vmem:[%s889_s3 + $0x78] sm:$0xff] }
  0x1b   :  { %141 = vbcast.lane.b32.xlu0 %v139_v12, 256  ;;  %128 = vmatprep.mubr.f32.mxu0 %v669_v1  ;;  %v571_v37 = vpack.c.bf16 %v201_v35, %v200_v34  ;;  %v575_v39 = vpack.c.bf16 %v203_v38, %v202_v36  ;;  %v293_v40 = vld [vmem:[%s890_s4] sm:$0xff]  ;;  %v294_v41 = vld [vmem:[%s890_s4 + $0x8] sm:$0xff]  ;;  %v295_v42 = vld [vmem:[%s890_s4 + $0x10] sm:$0xff] }
  0x1c   :  { %550 = vmatpush3.bf16.msra.mxu1 %v547_v18  ;;  %v580_v44 = vpack.c.bf16 %v294_v41, %v293_v40  ;;  %v296_v45 = vld [vmem:[%s890_s4 + $0x18] sm:$0xff]  ;;  %v297_v47 = vld [vmem:[%s890_s4 + $0x20] sm:$0xff]  ;;  %v298_v48 = vld [vmem:[%s890_s4 + $0x28] sm:$0xff] }
  0x1d   :  { %552 = vmatprep.subr.bf16.mxu1 %v551_v21  ;;  %v583_v46 = vpack.c.bf16 %v296_v45, %v295_v42  ;;  %v586_v49 = vpack.c.bf16 %v298_v48, %v297_v47  ;;  %v299_v50 = vld [vmem:[%s890_s4 + $0x30] sm:$0xff]  ;;  %v300_v51 = vld [vmem:[%s890_s4 + $0x38] sm:$0xff]  ;;  %v301_v36 = vld [vmem:[%s890_s4 + $0x40] sm:$0xff] }
  0x1e   :  { %435 = vmatmul.mubr.msk.f32.gmra.mrb[2].mxu0 %vm51_vm0, %v46_v15  ;;  %v589_v52 = vpack.c.bf16 %v300_v51, %v299_v50  ;;  %v304_v40 = vld [vmem:[%s890_s4 + $0x58] sm:$0xff]  ;;  %v305_v42 = vld [vmem:[%s890_s4 + $0x60] sm:$0xff] }
  0x1f   :  { %148 = vbcast.lane.b32.xlu0 %v146_v14, 256  ;;  %581 = vmatpush3.bf16.msra.mxu0 %v580_v44  ;;  %v306_v44 = vld [vmem:[%s890_s4 + $0x68] sm:$0xff]  ;;  %v308_v47 = vld [vmem:[%s890_s4 + $0x78] sm:$0xff] }
  0x20   :  { %554 = vmatpush3.bf16.msra.mxu1 %v551_v21  ;;  %582 = vmatprep.subr.bf16.mxu0 %v670_v43  ;;  %v598_v45 = vpack.c.bf16 %v306_v44, %v305_v42 }
  0x21   :  { %556 = vmatprep.subr.bf16.mxu1 %v555_v24  ;;  %540 = vmatprep.mubr.msk.f32.mxu0 %vm671_vm1, %v669_v1 }
  0x23   :  { %584 = vmatpush3.bf16.msra.mxu0 %v583_v46  ;;  %v307_v46 = vld [vmem:[%s890_s4 + $0x70] sm:$0xff] }
  0x24   :  { %558 = vmatpush3.bf16.msra.mxu1 %v555_v24  ;;  %585 = vmatprep.subr.bf16.mxu0 %v670_v43  ;;  %v601_v48 = vpack.c.bf16 %v308_v47, %v307_v46 }
  0x25   :  { %560 = vmatprep.subr.bf16.mxu1 %v559_v27 }
  0x27   :  { %587 = vmatpush3.bf16.msra.mxu0 %v586_v49 }
  0x28   :  { %562 = vmatpush3.bf16.msra.mxu1 %v559_v27  ;;  %588 = vmatprep.subr.bf16.mxu0 %v670_v43 }
  0x29   :  { %564 = vmatprep.subr.bf16.mxu1 %v563_v30 }
  0x2b   :  { %590 = vmatpush3.bf16.msra.mxu0 %v589_v52 }
  0x2c   :  { %566 = vmatpush3.bf16.msra.mxu1 %v563_v30  ;;  %591 = vmatprep.subr.bf16.mxu0 %v670_v43 }
  0x2d   :  { %568 = vmatprep.subr.bf16.mxu1 %v567_v33 }
  0x30   :  { %570 = vmatpush3.bf16.msra.mxu1 %v567_v33 }
  0x31   :  { %572 = vmatprep.subr.bf16.mxu1 %v571_v37 }
  0x34   :  { %574 = vmatpush3.bf16.msra.mxu1 %v571_v37  ;;  %v302_v37 = vld [vmem:[%s890_s4 + $0x48] sm:$0xff] }
  0x35   :  { %576 = vmatprep.subr.bf16.mxu1 %v575_v39  ;;  %v592_v38 = vpack.c.bf16 %v302_v37, %v301_v36 }
  0x37   :  { %593 = vmatpush3.bf16.msra.mxu0 %v592_v38 }
  0x38   :  { %578 = vmatpush3.bf16.msra.mxu1 %v575_v39  ;;  %594 = vmatprep.subr.bf16.mxu0 %v670_v43  ;;  %v303_v39 = vld [vmem:[%s890_s4 + $0x50] sm:$0xff] }
  0x39   :  { %v595_v41 = vpack.c.bf16 %v304_v40, %v303_v39 }
  0x3b   :  { %596 = vmatpush3.bf16.msra.mxu0 %v595_v41 }
  0x3c   :  { %597 = vmatprep.subr.bf16.mxu0 %v670_v43 }
  0x3f   :  { %599 = vmatpush3.bf16.msra.mxu0 %v598_v45 }
  0x40   :  { %600 = vmatprep.subr.bf16.mxu0 %v670_v43 }
  0x43   :  { %602 = vmatpush3.bf16.msra.mxu0 %v601_v48 }
  0x8d   :  { %v142_v12 = vpop.permute.xlu0 %141 }
  0x91   :  { %v149_v15 = vpop.permute.xlu0 %148 }
  0xed   :  { %v124_v53 = vpop.f32.mrb[0].mxu0 }
  0xee   :  { %v150_v54 = vrot.slane %v124_v53, 4  ;;  %v829_v55 = vpop.f32.mrb[1].mxu0 }
  0xf0   :  { %v151_v56 = vmax.f32 %v124_v53, %v150_v54 }
  0xf1   :  { %v130_v57 = vpop.f32.mrb[2].mxu0 }
  0xf2   :  { %v152_v58 = vrot.slane %v151_v56, 2  ;;  %v156_v59 = vrot.slane %v130_v57, 4  ;;  %v831_v60 = vpop.f32.mrb[3].mxu0 }
  0xf4   :  { %v153_v61 = vmax.f32 %v151_v56, %v152_v58  ;;  %v157_v62 = vmax.f32 %v130_v57, %v156_v59 }
  0xf6   :  { %v154_v63 = vrot.slane %v153_v61, 1  ;;  %v158_v3 = vrot.slane %v157_v62, 2 }
  0xf8   :  { %v155_v4 = vmax.f32 %v153_v61, %v154_v63  ;;  %v159_v5 = vmax.f32 %v157_v62, %v158_v3 }
  0xfa   :  { %v162_v6 = vsub.f32 %v124_v53, %v155_v4  ;;  %v160_v7 = vrot.slane %v159_v5, 1 }
  0xfc   :  { %v164_v8 = vmul.f32 1.442695, %v162_v6  ;;  %v161_v9 = vmax.f32 %v159_v5, %v160_v7 }
  0xfe   :  { %610 = vpow2.f32 %v164_v8  ;;  %v163_v10 = vsub.f32 %v130_v57, %v161_v9  ;;  %v437_v8 = vld [vmem:[%s892_s6] ss:$0 sm:$0xff] }
 0x100   :  { %v166_v11 = vmul.f32 1.442695, %v163_v10 }
 0x102   :  { %612 = vpow2.f32 %v166_v11 }
 0x108   :  { %v611_v13 = vpop.eup %610 }
 0x109   :  { %v168_v14 = vmul.f32 %v611_v13, %v142_v12  ;;  %v411_v12 = vand.u32 127, %v136_v0  ;;  %v407_v13 = vstv %s893_s7 }
 0x10b   :  { %v170_v16 = vrot.slane %v168_v14, 4 }
 0x10c   :  { %v613_v17 = vpop.eup %612 }
 0x10d   :  { %v171_v18 = vadd.f32 %v170_v16, %v168_v14  ;;  %v169_v19 = vmul.f32 %v613_v17, %v149_v15 }
 0x10f   :  { %v172_v20 = vrot.slane %v171_v18, 2  ;;  %v176_v21 = vrot.slane %v169_v19, 4 }
 0x111   :  { %v173_v22 = vadd.f32 %v172_v20, %v171_v18  ;;  %v177_v23 = vadd.f32 %v176_v21, %v169_v19 }
 0x113   :  { %v174_v24 = vrot.slane %v173_v22, 1  ;;  %v178_v25 = vrot.slane %v177_v23, 2 }
 0x115   :  { %v175_v26 = vadd.f32 %v174_v24, %v173_v22  ;;  %v179_v27 = vadd.f32 %v178_v25, %v177_v23 }
 0x117   :  { %v182_v28 = vadd.f32 1e-06, %v175_v26  ;;  %v180_v29 = vrot.slane %v179_v27, 1 }
 0x119   :  { %614 = vrcp.f32 %v182_v28  ;;  %v181_v30 = vadd.f32 %v180_v29, %v179_v27 }
 0x11b   :  { %v183_v31 = vadd.f32 1e-06, %v181_v30 }
 0x11d   :  { %616 = vrcp.f32 %v183_v31 }
 0x123   :  { %v615_v32 = vpop.eup %614 }
 0x124   :  { %v185_v33 = vmul.f32 %v615_v32, %v168_v14  ;;  %v414_v14 = vsub.s32 %v411_v12, %v732_v2 }
 0x126   :  { %505 = vmatprep.mubr.f32.mxu1 %v185_v33 }
 0x127   :  { %v617_v34 = vpop.eup %616 }
 0x128   :  { %v187_v35 = vmul.f32 %v617_v34, %v169_v19 }
 0x12a   :  { %506 = vmatmul.mubr.f32.vlgmr.msra.gmra.mrb[0].mxu1 %v187_v35 }
 0x1fd   :  { %v507_v49 = vpop.f32.mrb[0].mxu1 }
 0x1fe   :  { %v280_v50 = vmul.f32 %v507_v49, %v831_v60  ;;  %v270_v51 = vpop.f32.mrb[1].mxu1  ;;  %v436_v60 = vld [vmem:[%s891_s5] ss:$0 sm:$0xff]  ;;  %s672_s5 = smov [#allocation6]  }
 0x1ff   :  { %v279_v52 = vmul.f32 %v270_v51, %v829_v55  ;;  %s425_s21 = sshll.u32 %s672_s5, 4  ;;  %s426_s21 = int_to_ptr.vmem [resolvable:$true] %s425_s21 }
 0x200   :  { %v287_v43 = vrot.slane %v280_v50, 4  ;;  %s640_s6 = scalar_lea.vmem %s426_s21, 16  ;;  %s644_s22 = scalar_lea.vmem %s426_s21, 32 }
 0x201   :  { %v281_v53 = vrot.slane %v279_v52, 4  ;;  %p641_p8 = scmp.ne.s32.totalorder %s426_s21, %s640_s6  ;;  %p645_p9 = scmp.lt.s32.totalorder %s426_s21, %s426_s21 }
 0x202   :  { %v288_v54 = vadd.f32 %v287_v43, %v280_v50  ;;  %p646_p10 = scmp.lt.s32.totalorder %s644_s22, %s640_s6 }
 0x203   :  { %v282_v56 = vadd.f32 %v281_v53, %v279_v52 }
 0x204   :  { %v289_v57 = vrot.slane %v288_v54, 2  ;;  %p647_p11 = por %p646_p10, %p645_p9 }
 0x205   :  { %v283_v58 = vrot.slane %v282_v56, 2 }
 0x206   :  { %v290_v59 = vadd.f32 %v289_v57, %v288_v54  ;;  %p648_p12 = pnand %p647_p11, %p641_p8 }
 0x207   :  { %v284_v61 = vadd.f32 %v283_v58, %v282_v56 }
 0x208   :  { %v291_v62 = vrot.slane %v290_v59, 1 }
 0x209   :  { %v285_v63 = vrot.slane %v284_v61, 1 }
 0x20a   :  { %v292_v3 = vadd.f32 %v291_v62, %v290_v59 }
 0x20b   :  { %v286_v4 = vadd.f32 %v285_v63, %v284_v61 }
 0x20d   :  { %v319_v1 = vsel %vm318_vm2, %v292_v3, %v286_v4 }
 0x20e   :  { %541 = vmatmul.mubr.f32.vlgmr.msra.gmra.mrb[4].mxu0 %v319_v1 }
 0x2e1   :  { %v387_v55 = vpop.f32.mrb[4].mxu0 }
 0x2e2   :  { %v388_v5 = vadd.f32 %v436_v60, %v387_v55  ;;  %v542_v6 = vpop.f32.mrb[5].mxu0 }
 0x2e4   :  { %v392_v7 = vmul.f32 0.01, %v388_v5  ;;  %vm391_vm3 = vcmp.gt.f32.partialorder %v388_v5, 0.0 }
 0x2e6   :  { %v393_v9 = vsel %vm391_vm3, %v388_v5, %v392_v7 }
 0x2e7   :  { %v401_v10 = vmul.f32 %v437_v8, %v393_v9 }
 0x2e9   :  { %v403_v11 = vsel %vm402_vm4, %v401_v10, 0.0 }
 0x2ea   :  { %404 = vadd.xlane.f32.xlu1 %v403_v11 }
 0x377   :  { %v405_v15 = vpop.xlane.xlu1 %404 }
 0x378   :  { %v408_v16 = vadd.f32 %v407_v13, %v405_v15 }
 0x37a   :  { %v415_v17 = vrot.slane %v408_v16, %v414_v14 }
 0x37c   :  { %418 = vst.msk [vmem:[#allocation6] sm:$0x1] %vm417_vm5, %v415_v17 }
 0x37d   :  { %651 = shalt.err (!%p648_p12)
}
 0x37e   :  { %s652_s23 = scalar_lea.hbm %s894_s8, 16 }
 0x37f   :  { %p653_p13 = scmp.ne.s32.totalorder %s894_s8, %s652_s23  ;;  %p656_p0 = scmp.lt.u32.totalorder %s652_s23, %s894_s8 }
 0x381   :  { %p658_p1 = pnand %p656_p0, %p653_p13 }
 0x383   :  { %661 = shalt.err (!%p658_p1)
}
 0x384   :  { %428 = dma.vmem_to_hbm [thread:$0]  %s426_s21, 16, %s894_s8, [#allocation5]  }
 0x385   :  { %664 = dma.done.wait [#allocation5], 16  }
 0x386   :  { %665 = vsyncadd [#allocation5], 4294967280 }
 0x387   :  { %432 = vsyncpa [#allocation4], 1 }
 0x388   :  { %433 = vsyncpa [#allocation5], 1 }

</bundles_post_ra>
